<compile_context>
chip_gen: v5e
topology: v5e:2x2
jax: 0.10.0
libtpu: 0.0.40
codegen_flags: <defaults>
</compile_context>

<pallas_src>
import functools

import jax
import jax.numpy as jnp
from jax.experimental import pallas as pl
from jax.experimental.pallas import tpu as pltpu


def _round_up(x, m):
    return (x + m - 1) // m * m


def _sublane_quantum(dtype):
    """Second-to-last-dim packing quantum: 8 (32-bit), 16 (16-bit), 32 (8-bit)."""
    return 32 // jnp.dtype(dtype).itemsize


def _tpu_info():
    """Returns (tensorcores_per_device, vmem_capacity_bytes), conservative fallbacks."""
    vmem_cap = 64 * 1024 * 1024  # v7x per-TensorCore VMEM (smallest current gen)
    try:
        vmem_cap = int(pltpu.get_tpu_info().vmem_capacity_bytes)
    except Exception:
        pass
    n_tc = 1
    try:
        kind = jax.local_devices()[0].device_kind.lower()
        # v5e/v6e ("lite") and v2/v3 per-core devices: one TensorCore per device.
        # v4/v5p megacore and v7x: two TensorCores share the "parallel" grid axes.
        n_tc = 1 if any(t in kind for t in ("lite", "v5e", "v6e", "v2", "v3")) else 2
    except Exception:
        pass
    return n_tc, vmem_cap


def _vmem_bytes_per_step(bb, n_img, n_gene, img_dim, gene_dim, p, out_dim,
                         act_itemsize, w_itemsize, weight_buffers):
    """Rough per-grid-step VMEM working set (bytes)."""
    f32 = 4
    act_in = 2 * bb * (n_img * img_dim + n_gene * gene_dim) * act_itemsize  # dbl-buffered inputs
    weights = weight_buffers * (img_dim + gene_dim) * 3 * p * w_itemsize    # fused QKV weights
    outs = 2 * bb * (n_img + n_gene) * out_dim * act_itemsize               # dbl-buffered outputs
    inter = bb * (n_img + n_gene) * 3 * p * f32                             # f32 projections
    inter += 2 * bb * n_img * n_gene * f32                                  # both score matrices
    inter += bb * (n_img + n_gene) * p * f32                                # attention accumulators
    return act_in + weights + outs + 2 * inter                              # 2x fudge for temporaries


def _pick_batch_block(B, n_img, n_gene, act_dtype, min_grid, fits):
    """Largest divisor bb of B with grid extent >= min_grid that fits VMEM.

    bb > 1 is only allowed when both sequence lengths are aligned to the
    activation dtype's sublane quantum, so the in-kernel (bb*N, dim) reshape
    does not force a relayout."""
    q = _sublane_quantum(act_dtype)
    seq_aligned = (n_img % q == 0) and (n_gene % q == 0)
    best = 1
    for bb in range(1, B + 1):
        if B % bb != 0 or B // bb < min_grid:
            continue
        if bb > 1 and not seq_aligned:
            continue
        if not fits(bb):
            continue
        best = bb
    return best


def _coattention_kernel(img_ref, gene_ref, w_img_ref, w_gene_ref,
                        out_ig_ref, out_gi_ref):
    bb, n_img, img_dim = img_ref.shape
    _, n_gene, gene_dim = gene_ref.shape
    p = w_img_ref.shape[1] // 3          # lane-padded output dim (multiple of 128)
    out_dim = out_ig_ref.shape[-1]
    act_dtype = img_ref.dtype

    # Fused Q/K/V projections over all bb*N rows in one MXU push per modality.
    # (bb==1: reshape just drops the leading dim; bb>1 is alignment-guarded.)
    x_img = img_ref[...].reshape(bb * n_img, img_dim)
    x_gene = gene_ref[...].reshape(bb * n_gene, gene_dim)
    proj_img = jnp.dot(x_img, w_img_ref[...],
                       preferred_element_type=jnp.float32).reshape(bb, n_img, 3 * p)
    proj_gene = jnp.dot(x_gene, w_gene_ref[...],
                        preferred_element_type=jnp.float32).reshape(bb, n_gene, 3 * p)

    # Lane slices at multiples of 128 -> tile aligned, no relayout. Cast back to
    # the activation dtype so QK^T / PV use the fast (bf16) MXU path for
    # low-precision models; for f32 activations the casts are no-ops.
    def qkv(proj):
        return (proj[..., 0:p].astype(act_dtype),
                proj[..., p:2 * p].astype(act_dtype),
                proj[..., 2 * p:3 * p].astype(act_dtype))

    q_img, k_img, v_img = qkv(proj_img)
    q_gene, k_gene, v_gene = qkv(proj_gene)

    def attend(q, k, v, out_ref):
        # Batched QK^T contracting the feature dim: no explicit transpose; the
        # zero-padded feature lanes contribute nothing to the scores.
        s = jnp.einsum('bqd,bkd->bqk', q, k, preferred_element_type=jnp.float32)
        # Softmax in f32; no 1/sqrt(d) scale (matches the PyTorch reference).
        s = s - jnp.max(s, axis=-1, keepdims=True)
        e = jnp.exp(s)
        probs = e * pl.reciprocal(jnp.sum(e, axis=-1, keepdims=True))
        out = jnp.einsum('bqk,bkd->bqd', probs.astype(v.dtype), v,
                         preferred_element_type=jnp.float32)
        # Store only the real out_dim lanes: avoids padded HBM writes plus a
        # wrapper-side re-slice pass when out_dim << 128.
        out_ref[...] = out[..., :out_dim].astype(out_ref.dtype)

    attend(q_img, k_gene, v_gene, out_ig_ref)   # img attends to gene
    attend(q_gene, k_img, v_img, out_gi_ref)    # gene attends to img


def fuse_coattention_params(params):
    """Pre-fuse & lane-pad the Q/K/V weights ONCE (call at init, not per forward)."""
    out_dim = params["wq_img"].shape[1]
    p = _round_up(out_dim, 128)

    def fuse(wq, wk, wv):
        pad = lambda w: jnp.pad(w, ((0, 0), (0, p - out_dim)))
        return jnp.concatenate([pad(wq), pad(wk), pad(wv)], axis=1)  # (in_dim, 3p)

    return {
        "w_img": fuse(params["wq_img"], params["wk_img"], params["wv_img"]),
        "w_gene": fuse(params["wq_gene"], params["wk_gene"], params["wv_gene"]),
        "out_dim": out_dim,
    }


_WEIGHT_SINGLE_BUFFER_BYTES = 1 << 20  # single-buffer the weight blocks above 1 MiB


def co_attention(img_features, gene_features, params):
    """Pallas CoAttention forward.

    img_features : (B, N_img,  img_dim)
    gene_features: (B, N_gene, gene_dim)
    params: either raw per-projection weights (each (in_dim, output_dim)) or the
            pre-fused dict from fuse_coattention_params (preferred: fuse once).
    returns: (attention_img_gene (B, N_img, out_dim),
              attention_gene_img (B, N_gene, out_dim))
    """
    if "w_img" not in params:
        params = fuse_coattention_params(params)  # fallback; prefer fusing once
    w_img, w_gene, out_dim = params["w_img"], params["w_gene"], params["out_dim"]

    B, n_img, img_dim = img_features.shape
    B2, n_gene, gene_dim = gene_features.shape
    assert B == B2, "batch mismatch between img and gene features"
    dtype = img_features.dtype
    p = w_img.shape[1] // 3  # lane-padded output dim (multiple of 128)

    n_tc, vmem_cap = _tpu_info()
    act_bytes = jnp.dtype(dtype).itemsize
    w_bytes = jnp.dtype(w_img.dtype).itemsize

    # Grid-invariant weight blocks: once they are big enough for double-buffering
    # to matter (v7x 64 MiB fit), request a single VMEM buffer.
    weight_block_bytes = max(img_dim, gene_dim) * 3 * p * w_bytes
    single_buffer_weights = weight_block_bytes > _WEIGHT_SINGLE_BUFFER_BYTES
    w_buffers = 1 if single_buffer_weights else 2

    est = functools.partial(
        _vmem_bytes_per_step, n_img=n_img, n_gene=n_gene, img_dim=img_dim,
        gene_dim=gene_dim, p=p, out_dim=out_dim, act_itemsize=act_bytes,
        w_itemsize=w_bytes, weight_buffers=w_buffers)

    # Batch-block selection: single-TC chips take the largest bb that fits VMEM
    # (ideally grid=(1,)); dual-TC parts keep a parallel extent of >= 2.
    budget = vmem_cap // 2
    bb = _pick_batch_block(B, n_img, n_gene, dtype, min_grid=n_tc,
                           fits=lambda b: est(bb=b) <= budget)
    grid = (B // bb,)

    # Working-set-derived VMEM limit, capped at 75% of physical VMEM (never the
    # whole of v7x's 64 MiB; generous floor so compiler scratch always fits).
    vmem_limit = min(int(0.75 * vmem_cap),
                     max(32 * 1024 * 1024, 2 * est(bb=bb) + 4 * 1024 * 1024))

    def w_spec(in_dim):
        kwargs = {}
        if single_buffer_weights:
            # Constant index_map -> never re-DMAed; one buffer halves footprint.
            kwargs["pipeline_mode"] = pl.Buffered(1)
        return pl.BlockSpec((in_dim, 3 * p), lambda b: (0, 0), **kwargs)

    out_ig, out_gi = pl.pallas_call(
        _coattention_kernel,
        out_shape=(
            jax.ShapeDtypeStruct((B, n_img, out_dim), dtype),
            jax.ShapeDtypeStruct((B, n_gene, out_dim), dtype),
        ),
        grid=grid,
        in_specs=[
            # 3-D blocks whose last two dims equal the full array dims -> legal
            # for any (possibly unaligned) sequence length.
            pl.BlockSpec((bb, n_img, img_dim), lambda b: (b, 0, 0)),
            pl.BlockSpec((bb, n_gene, gene_dim), lambda b: (b, 0, 0)),
            w_spec(img_dim),    # fused img QKV  (in_dim, 3p)
            w_spec(gene_dim),   # fused gene QKV (in_dim, 3p)
        ],
        out_specs=(
            pl.BlockSpec((bb, n_img, out_dim), lambda b: (b, 0, 0)),
            pl.BlockSpec((bb, n_gene, out_dim), lambda b: (b, 0, 0)),
        ),
        compiler_params=pltpu.CompilerParams(
            dimension_semantics=("parallel",),
            vmem_limit_bytes=vmem_limit),
    )(img_features, gene_features, w_img, w_gene)

    return out_ig, out_gi


def _reference(img_features, gene_features, params):
    f32 = jnp.float32
    img = img_features.astype(f32)
    gene = gene_features.astype(f32)
    q_img = img @ params["wq_img"].astype(f32)
    k_img = img @ params["wk_img"].astype(f32)
    v_img = img @ params["wv_img"].astype(f32)
    q_gene = gene @ params["wq_gene"].astype(f32)
    k_gene = gene @ params["wk_gene"].astype(f32)
    v_gene = gene @ params["wv_gene"].astype(f32)
    a_ig = jax.nn.softmax(q_img @ jnp.swapaxes(k_gene, -2, -1), axis=-1) @ v_gene
    a_gi = jax.nn.softmax(q_gene @ jnp.swapaxes(k_img, -2, -1), axis=-1) @ v_img
    return a_ig, a_gi


def init_params(key, img_dim, gene_dim, output_dim, dtype=jnp.float32):
    # Deterministic uniform init mimicking nn.Linear default (bias=False).
    keys = jax.random.split(key, 6)

    def lin(k, in_dim):
        bound = 1.0 / jnp.sqrt(in_dim)
        # stored as (in_dim, out_dim) so y = x @ W
        return jax.random.uniform(k, (in_dim, output_dim), dtype,
                                  minval=-bound, maxval=bound)

    return {
        "wq_img":  lin(keys[0], img_dim),
        "wk_img":  lin(keys[1], img_dim),
        "wv_img":  lin(keys[2], img_dim),
        "wq_gene": lin(keys[3], gene_dim),
        "wk_gene": lin(keys[4], gene_dim),
        "wv_gene": lin(keys[5], gene_dim),
    }


if __name__ == "__main__":
    B, N_IMG, N_GENE = 2, 16, 8
    IMG_DIM, GENE_DIM, OUT_DIM = 32, 24, 32

    key = jax.random.PRNGKey(0)
    k_img, k_gene, k_param = jax.random.split(key, 3)
    img_features = jax.random.normal(k_img, (B, N_IMG, IMG_DIM), jnp.float32)
    gene_features = jax.random.normal(k_gene, (B, N_GENE, GENE_DIM), jnp.float32)
    params = init_params(k_param, IMG_DIM, GENE_DIM, OUT_DIM)

    # Fuse/pad the QKV weights once (as the review asks), then run the kernel.
    fused = fuse_coattention_params(params)
    attn_ig, attn_gi = co_attention(img_features, gene_features, fused)
    jax.block_until_ready((attn_ig, attn_gi))

    ref_ig, ref_gi = _reference(img_features, gene_features, params)
    assert attn_ig.shape == (B, N_IMG, OUT_DIM)
    assert attn_gi.shape == (B, N_GENE, OUT_DIM)
    assert jnp.allclose(attn_ig, ref_ig, atol=2e-4, rtol=2e-4)
    assert jnp.allclose(attn_gi, ref_gi, atol=2e-4, rtol=2e-4)

    print("KERNEL_OK")
</pallas_src>

<mosaic_0001>
module attributes {stable_mosaic.version = 11 : i64} {
  func.func @_coattention_kernel(%arg0: i32, %arg1: memref<1x16x32xf32, #tpu.memory_space<vmem>>, %arg2: memref<1x8x24xf32, #tpu.memory_space<vmem>>, %arg3: memref<32x384xf32, #tpu.memory_space<vmem>>, %arg4: memref<24x384xf32, #tpu.memory_space<vmem>>, %arg5: memref<1x16x32xf32, #tpu.memory_space<vmem>>, %arg6: memref<1x8x32xf32, #tpu.memory_space<vmem>>) attributes {dimension_semantics = [#tpu.dimension_semantics<parallel>], iteration_bounds = array<i64: 2>, scalar_prefetch = 0 : i64, scratch_operands = 0 : i64, tpu.core_type = #tpu.core_type<tc>, window_params = [{transform_indices = @transform_0, window_bounds = array<i64: 1, 16, 32>}, {transform_indices = @transform_1, window_bounds = array<i64: 1, 8, 24>}, {pipeline_mode = #tpu.pipeline_mode<synchronous>, transform_indices = @transform_2, window_bounds = array<i64: 32, 384>}, {pipeline_mode = #tpu.pipeline_mode<synchronous>, transform_indices = @transform_3, window_bounds = array<i64: 24, 384>}, {transform_indices = @transform_4, window_bounds = array<i64: 1, 16, 32>}, {transform_indices = @transform_5, window_bounds = array<i64: 1, 8, 32>}]} {
    %c0 = arith.constant 0 : index
    %c0_0 = arith.constant 0 : index
    %c0_1 = arith.constant 0 : index
    %0 = vector.load %arg1[%c0, %c0_0, %c0_1] : memref<1x16x32xf32, #tpu.memory_space<vmem>>, vector<1x16x32xf32>
    %1 = vector.shape_cast %0 : vector<1x16x32xf32> to vector<16x32xf32>
    %c0_2 = arith.constant 0 : index
    %c0_3 = arith.constant 0 : index
    %c0_4 = arith.constant 0 : index
    %2 = vector.load %arg2[%c0_2, %c0_3, %c0_4] : memref<1x8x24xf32, #tpu.memory_space<vmem>>, vector<1x8x24xf32>
    %3 = vector.shape_cast %2 : vector<1x8x24xf32> to vector<8x24xf32>
    %c0_5 = arith.constant 0 : index
    %c0_6 = arith.constant 0 : index
    %4 = vector.load %arg3[%c0_5, %c0_6] : memref<32x384xf32, #tpu.memory_space<vmem>>, vector<32x384xf32>
    %cst = arith.constant dense<0.000000e+00> : vector<16x384xf32>
    %5 = tpu.matmul %1, %4, %cst {dimension_numbers = #tpu.dot_dimension_numbers<[1], [0], [0], [1], [0, 0, 1, 1], [], []>} : vector<16x32xf32>, vector<32x384xf32>, vector<16x384xf32> -> vector<16x384xf32>
    %6 = vector.shape_cast %5 : vector<16x384xf32> to vector<1x16x384xf32>
    %c0_7 = arith.constant 0 : index
    %c0_8 = arith.constant 0 : index
    %7 = vector.load %arg4[%c0_7, %c0_8] : memref<24x384xf32, #tpu.memory_space<vmem>>, vector<24x384xf32>
    %cst_9 = arith.constant dense<0.000000e+00> : vector<8x384xf32>
    %8 = tpu.matmul %3, %7, %cst_9 {dimension_numbers = #tpu.dot_dimension_numbers<[1], [0], [0], [1], [0, 0, 1, 1], [], []>} : vector<8x24xf32>, vector<24x384xf32>, vector<8x384xf32> -> vector<8x384xf32>
    %9 = vector.shape_cast %8 : vector<8x384xf32> to vector<1x8x384xf32>
    %10 = vector.extract_strided_slice %6 {offsets = [0, 0, 0], sizes = [1, 16, 128], strides = [1, 1, 1]} : vector<1x16x384xf32> to vector<1x16x128xf32>
    %11 = vector.extract_strided_slice %6 {offsets = [0, 0, 128], sizes = [1, 16, 128], strides = [1, 1, 1]} : vector<1x16x384xf32> to vector<1x16x128xf32>
    %12 = vector.extract_strided_slice %6 {offsets = [0, 0, 256], sizes = [1, 16, 128], strides = [1, 1, 1]} : vector<1x16x384xf32> to vector<1x16x128xf32>
    %13 = vector.extract_strided_slice %9 {offsets = [0, 0, 0], sizes = [1, 8, 128], strides = [1, 1, 1]} : vector<1x8x384xf32> to vector<1x8x128xf32>
    %14 = vector.extract_strided_slice %9 {offsets = [0, 0, 128], sizes = [1, 8, 128], strides = [1, 1, 1]} : vector<1x8x384xf32> to vector<1x8x128xf32>
    %15 = vector.extract_strided_slice %9 {offsets = [0, 0, 256], sizes = [1, 8, 128], strides = [1, 1, 1]} : vector<1x8x384xf32> to vector<1x8x128xf32>
    "tpu.trace_start"() <{level = 10 : i32, message = "bqd,bkd->bqk"}> : () -> ()
    %cst_10 = arith.constant dense<0.000000e+00> : vector<1x16x8xf32>
    %16 = tpu.matmul %10, %14, %cst_10 {dimension_numbers = #tpu.dot_dimension_numbers<[2], [2], [1], [1], [0, 0, 0, 1, 1, 1], [0], [0]>} : vector<1x16x128xf32>, vector<1x8x128xf32>, vector<1x16x8xf32> -> vector<1x16x8xf32>
    "tpu.trace_stop"() : () -> ()
    %cst_11 = arith.constant dense<0xFF800000> : vector<1x16xf32>
    %17 = vector.multi_reduction <maximumf>, %16, %cst_11 [2] : vector<1x16x8xf32> to vector<1x16xf32>
    %18 = vector.shape_cast %17 : vector<1x16xf32> to vector<1x16x1xf32>
    %19 = vector.broadcast %18 : vector<1x16x1xf32> to vector<1x16x8xf32>
    %20 = arith.subf %16, %19 : vector<1x16x8xf32>
    %21 = math.exp %20 : vector<1x16x8xf32>
    %cst_12 = arith.constant dense<0.000000e+00> : vector<1x16xf32>
    %22 = vector.multi_reduction <add>, %21, %cst_12 [2] : vector<1x16x8xf32> to vector<1x16xf32>
    %23 = vector.shape_cast %22 : vector<1x16xf32> to vector<1x16x1xf32>
    %24 = tpu.reciprocal %23 : vector<1x16x1xf32> -> vector<1x16x1xf32>
    %25 = vector.broadcast %24 : vector<1x16x1xf32> to vector<1x16x8xf32>
    %26 = arith.mulf %21, %25 : vector<1x16x8xf32>
    "tpu.trace_start"() <{level = 10 : i32, message = "bqk,bkd->bqd"}> : () -> ()
    %cst_13 = arith.constant dense<0.000000e+00> : vector<1x16x128xf32>
    %27 = tpu.matmul %26, %15, %cst_13 {dimension_numbers = #tpu.dot_dimension_numbers<[2], [1], [1], [2], [0, 0, 0, 1, 1, 2], [0], [0]>} : vector<1x16x8xf32>, vector<1x8x128xf32>, vector<1x16x128xf32> -> vector<1x16x128xf32>
    "tpu.trace_stop"() : () -> ()
    %28 = vector.extract_strided_slice %27 {offsets = [0, 0, 0], sizes = [1, 16, 32], strides = [1, 1, 1]} : vector<1x16x128xf32> to vector<1x16x32xf32>
    %c0_14 = arith.constant 0 : index
    %c0_15 = arith.constant 0 : index
    %c0_16 = arith.constant 0 : index
    %29 = vector.load %arg5[%c0_14, %c0_15, %c0_16] : memref<1x16x32xf32, #tpu.memory_space<vmem>>, vector<1x16x32xf32>
    tpu.vector_store %arg5[%c0_14, %c0_15, %c0_16], %28 {strides = array<i32>} : memref<1x16x32xf32, #tpu.memory_space<vmem>>, vector<1x16x32xf32>,
    "tpu.trace_start"() <{level = 10 : i32, message = "bqd,bkd->bqk"}> : () -> ()
    %cst_17 = arith.constant dense<0.000000e+00> : vector<1x8x16xf32>
    %30 = tpu.matmul %13, %11, %cst_17 {dimension_numbers = #tpu.dot_dimension_numbers<[2], [2], [1], [1], [0, 0, 0, 1, 1, 1], [0], [0]>} : vector<1x8x128xf32>, vector<1x16x128xf32>, vector<1x8x16xf32> -> vector<1x8x16xf32>
    "tpu.trace_stop"() : () -> ()
    %cst_18 = arith.constant dense<0xFF800000> : vector<1x8xf32>
    %31 = vector.multi_reduction <maximumf>, %30, %cst_18 [2] : vector<1x8x16xf32> to vector<1x8xf32>
    %32 = vector.shape_cast %31 : vector<1x8xf32> to vector<1x8x1xf32>
    %33 = vector.broadcast %32 : vector<1x8x1xf32> to vector<1x8x16xf32>
    %34 = arith.subf %30, %33 : vector<1x8x16xf32>
    %35 = math.exp %34 : vector<1x8x16xf32>
    %cst_19 = arith.constant dense<0.000000e+00> : vector<1x8xf32>
    %36 = vector.multi_reduction <add>, %35, %cst_19 [2] : vector<1x8x16xf32> to vector<1x8xf32>
    %37 = vector.shape_cast %36 : vector<1x8xf32> to vector<1x8x1xf32>
    %38 = tpu.reciprocal %37 : vector<1x8x1xf32> -> vector<1x8x1xf32>
    %39 = vector.broadcast %38 : vector<1x8x1xf32> to vector<1x8x16xf32>
    %40 = arith.mulf %35, %39 : vector<1x8x16xf32>
    "tpu.trace_start"() <{level = 10 : i32, message = "bqk,bkd->bqd"}> : () -> ()
    %cst_20 = arith.constant dense<0.000000e+00> : vector<1x8x128xf32>
    %41 = tpu.matmul %40, %12, %cst_20 {dimension_numbers = #tpu.dot_dimension_numbers<[2], [1], [1], [2], [0, 0, 0, 1, 1, 2], [0], [0]>} : vector<1x8x16xf32>, vector<1x16x128xf32>, vector<1x8x128xf32> -> vector<1x8x128xf32>
    "tpu.trace_stop"() : () -> ()
    %42 = vector.extract_strided_slice %41 {offsets = [0, 0, 0], sizes = [1, 8, 32], strides = [1, 1, 1]} : vector<1x8x128xf32> to vector<1x8x32xf32>
    %c0_21 = arith.constant 0 : index
    %c0_22 = arith.constant 0 : index
    %c0_23 = arith.constant 0 : index
    %43 = vector.load %arg6[%c0_21, %c0_22, %c0_23] : memref<1x8x32xf32, #tpu.memory_space<vmem>>, vector<1x8x32xf32>
    tpu.vector_store %arg6[%c0_21, %c0_22, %c0_23], %42 {strides = array<i32>} : memref<1x8x32xf32, #tpu.memory_space<vmem>>, vector<1x8x32xf32>,
    return
  }
  func.func @transform_0(%arg0: i32) -> (i32, i32, i32) {
    %c0_i32 = arith.constant 0 : i32
    %c0_i32_0 = arith.constant 0 : i32
    %c0_i32_1 = arith.constant 0 : i32
    return %arg0, %c0_i32, %c0_i32_0 : i32, i32, i32
  }
  func.func @transform_1(%arg0: i32) -> (i32, i32, i32) {
    %c0_i32 = arith.constant 0 : i32
    %c0_i32_0 = arith.constant 0 : i32
    %c0_i32_1 = arith.constant 0 : i32
    return %arg0, %c0_i32, %c0_i32_0 : i32, i32, i32
  }
  func.func @transform_2(%arg0: i32) -> (i32, i32) {
    %c0_i32 = arith.constant 0 : i32
    %c0_i32_0 = arith.constant 0 : i32
    %c0_i32_1 = arith.constant 0 : i32
    return %c0_i32, %c0_i32_0 : i32, i32
  }
  func.func @transform_3(%arg0: i32) -> (i32, i32) {
    %c0_i32 = arith.constant 0 : i32
    %c0_i32_0 = arith.constant 0 : i32
    %c0_i32_1 = arith.constant 0 : i32
    return %c0_i32, %c0_i32_0 : i32, i32
  }
  func.func @transform_4(%arg0: i32) -> (i32, i32, i32) {
    %c0_i32 = arith.constant 0 : i32
    %c0_i32_0 = arith.constant 0 : i32
    %c0_i32_1 = arith.constant 0 : i32
    return %arg0, %c0_i32, %c0_i32_0 : i32, i32, i32
  }
  func.func @transform_5(%arg0: i32) -> (i32, i32, i32) {
    %c0_i32 = arith.constant 0 : i32
    %c0_i32_0 = arith.constant 0 : i32
    %c0_i32_1 = arith.constant 0 : i32
    return %arg0, %c0_i32, %c0_i32_0 : i32, i32, i32
  }
}

</mosaic_0001>

<bundles_post_ra>
// kernel: tpu_custom_call.1
= control target key start
LH: loop header
LB: loop body
LE: loop exit
PB: predicated region body
PF: predicated region fallthrough
CT: control target
= control target key end

     0   :  { %s1485_s0 = inlined_call_operand.hbm [shape: f32[2,16,32], index: 0, kind: input, shape index: {}]   ;;  %s1486_s1 = inlined_call_operand.hbm [shape: f32[2,8,24], index: 1, kind: input, shape index: {}]   ;;  %s1487_s2 = inlined_call_operand.hbm [shape: f32[32,384], index: 2, kind: input, shape index: {}]   ;;  %s1488_s3 = inlined_call_operand.hbm [shape: f32[24,384], index: 3, kind: input, shape index: {}]   ;;  %s1489_s4 = inlined_call_operand.hbm [shape: f32[2,16,32], index: 4, kind: output, shape index: {0}]   ;;  %s1490_s5 = inlined_call_operand.hbm [shape: f32[2,8,32], index: 5, kind: output, shape index: {1}]  }
   0x1   :  { %1492 = sst [smem:[#allocation21_spill]] %s1485_s0 }
   0x2   :  { %1493 = sst [smem:[#allocation22_spill]] %s1487_s2 }
   0x3   :  { %1494 = sst [smem:[#allocation23_spill]] %s1488_s3 }
   0x4   :  { %11 = vsyncpa [#allocation3], 0 }
   0x5   :  { %13 = vsyncpa [#allocation3 + $0x1], 0 }
   0x6   :  { %14 = vsyncpa [#allocation6], 0 }
   0x7   :  { %16 = vsyncpa [#allocation6 + $0x1], 0 }
   0x8   :  { %17 = vsyncpa [#allocation9], 0 }
   0x9   :  { %18 = vsyncpa [#allocation4], 0 }
   0xa   :  { %20 = vsyncpa [#allocation4 + $0x1], 0 }
   0xb   :  { %21 = vsyncpa [#allocation12], 0 }
   0xc   :  { %23 = vsyncpa [#allocation12 + $0x1], 0  ;;  %s1250_s18 = smov 0   ;;  %s1252_s19 = smov 0  }
   0xd   :  { %s1254_s20 = smov 0   ;;  %s1256_s21 = smov 0  }
   0xe LB: > { %1495 = sst [smem:[#allocation19_spill]] %s1206_s20  ;;  %s1271_s22 = sadd.s32 4294967295, %s1210_s21   ;;  %s1210_s21 = sphi %s1256_s21, %s1510_s21   ;;  %s1206_s20 = sphi %s1254_s20, %s1507_s20   ;;  %s1202_s19 = sphi %s1252_s19, %s1509_s19   ;;  %s1198_s18 = sphi %s1250_s18, %s1508_s18  }
   0xf   : > { %s847_s23 = sadd.s32 4294967294, %s1210_s21   ;;  %p49_p0 = scmp.ne.s32.totalorder %s1202_s19, %s1198_s18 }
  0x10   : > { %p50_p1 = scmp.eq.s32.totalorder %s1271_s22, 0  ;;  %p141_p2 = scmp.eq.s32.totalorder %s1271_s22, 1 }
  0x11   : > { %p147_p3 = scmp.eq.s32.totalorder %s847_s23, 1  ;;  %p848_p5 = scmp.ge.s32.totalorder %s1210_s21, 1 }
  0x12   : > { %p1280_p4 = por %p50_p1, %p49_p0  ;;  %p180_p7 = scmp.lt.s32.totalorder %s1210_s21, 3 }
  0x13   : > { %p1285_p6 = por %p147_p3, %p49_p0  ;;  %s1498_s2 = sld [smem:[#allocation22_spill]] }
  0x14   : > { %p1293_p8 = pnand %p848_p5, %p180_p7  ;;  %s1212_s30 = smov [#allocation7]  }
  0x15   : > { %s193_s6 = sshll.u32 %s1212_s30, 4  ;;  %s1500_s3 = sld [smem:[#allocation23_spill]]  ;;  %s194_s6 = int_to_ptr.vmem [resolvable:$true] %s193_s6 }
  0x16   : > { %p901_p9 = pneg %p1293_p8  ;;  %s1213_s10 = smov 384  }
  0x17   : > { %s1214_s11 = smov 24   ;;  %s1215_s12 = smov [#allocation8]  }
  0x18   : > { %p902_p10 = pnand %p901_p9, %p50_p1  ;;  %s207_s13 = sshll.u32 %s1215_s12, 4  ;;  %s208_s13 = int_to_ptr.vmem [resolvable:$true] %s207_s13 }
  0x19   : > { %s191_s28 = sshll.u32 %s1498_s2, 4  ;;  %s1306_s14 = sadd.s32 1, %s1210_s21   ;;  %s192_s28 = int_to_ptr.hbm [resolvable:$true] %s191_s28 }
  0x1a   : > { %904 = dma.hbm_to_vmem [thread:$0]  (!%p902_p10), %s192_s28, 1536, %s194_s6, [#allocation6], %s1213_s10, %s1213_s10, %s1214_s11  }
  0x1b   : > { %s205_s9 = sshll.u32 %s1500_s3, 4  ;;  %s36_s15 = sadd.s32 1, %s1206_s20  ;;  %s206_s9 = int_to_ptr.hbm [resolvable:$true] %s205_s9 }
  0x1c   : > { %907 = dma.hbm_to_vmem [thread:$0]  (!%p902_p10), %s206_s9, 1152, %s208_s13, [#allocation9], %s1213_s10, %s1213_s10, %s1214_s11  }
  0x1d   : > { %s33_s16 = ssub.s32 %s1210_s21, %s1306_s14  ;;  %p43_p12 = scmp.ne.s32.totalorder %s1206_s20, %s1202_s19 }
  0x1e   : > { %p34_p13 = scmp.eq.s32.totalorder %s33_s16, 0  ;;  %p44_p0 = scmp.eq.s32.totalorder %s1210_s21, 0 }
  0x1f   : > { %p1316_p3 = por %p141_p2, %p43_p12  ;;  %p924_p5 = scmp.lt.s32.totalorder %s1210_s21, 2 }
  0x20   : > { %s1322_s23 = scalar_select %p34_p13, %s1206_s20, %s36_s15  }
  0x21   : > { %p45_p7 = por %p44_p0, %p43_p12  ;;  %s1325_s26 = sand.u32 1, %s1206_s20  }
  0x22   : > { %1502 = sst [smem:[#allocation20_spill]] %s1322_s23  ;;  %s852_s27 = sshll.u32 %s1325_s26, 4 }
  0x23   : > { %s883_s28 = sshll.u32 %s1210_s21, 4  ;;  %s1503_s0 = sld [smem:[#allocation21_spill]] }
  0x24   : > { %s225_s8 = scalar_lea.vmem [#allocation2], %s852_s27  ;;  %p1332_p2 = pnand %p924_p5, %p45_p7 }
  0x25   : > { %s233_s9 = sshll.u32 %s225_s8, 4  ;;  %s243_s12 = sand.u32 1, %s1210_s21   ;;  %s234_s9 = int_to_ptr.vmem [resolvable:$true] %s233_s9 }
  0x26   : > { %s222_s13 = scalar_lea.sflag [#allocation3], %s1325_s26  ;;  %p1044_p10 = pneg %p1332_p2 }
  0x29   : > { %s230_s7 = scalar_lea.hbm %s1503_s0, %s883_s28  ;;  %s1047_s30 = scalar_lea.hbm %s1503_s0, 32 }
  0x2a   : > { %s231_s10 = sshll.u32 %s230_s7, 4  ;;  %s232_s10 = int_to_ptr.hbm [resolvable:$true] %s231_s10 }
  0x2b   : > { %s1040_s15 = sshra.s32 %s232_s10, 4  ;;  %s1041_s15 = int_to_ptr.hbm [resolvable:$true] %s1040_s15 }
  0x2c   : > { %s1042_s16 = scalar_lea.hbm %s1041_s15, 16  ;;  %p1048_p0 = scmp.lt.s32.totalorder %s1041_s15, %s1503_s0 }
  0x2d   : > { %p1043_p9 = scmp.ne.s32.totalorder %s1041_s15, %s1042_s16  ;;  %p1049_p5 = scmp.lt.s32.totalorder %s1047_s30, %s1042_s16 }
  0x2f   : > { %p1045_p12 = pnand %p1044_p10, %p1043_p9  ;;  %p1050_p7 = por %p1049_p5, %p1048_p0 }
  0x31   : > { %p1046_p13 = pneg %p1045_p12 }
  0x33   : > { %p1051_p11 = pnand %p1050_p7, %p1046_p13 }
  0x35   : > { %1054 = shalt.err (!%p1051_p11)
}
  0x36   : > { %s1216_s8 = smov 128   ;;  %s1217_s2 = smov 8  }
  0x37   : > { %911 = dma.hbm_to_vmem [thread:$0]  (!%p1332_p2), %s232_s10, 256, %s234_s9, %s222_s13, %s1216_s8, %s1216_s8, %s1217_s2  }
  0x38   : > { %s855_s3 = sshll.u32 %s1325_s26, 3  ;;  %s856_s23 = sshll.u32 %s1210_s21, 3 }
  0x39   : > { %s251_s20 = scalar_lea.hbm %s1486_s1, %s856_s23  ;;  %s247_s6 = scalar_lea.vmem [#allocation5], %s855_s3 }
  0x3a   : > { %s255_s15 = sshll.u32 %s247_s6, 4  ;;  %s253_s16 = sshll.u32 %s251_s20, 4  ;;  %s256_s15 = int_to_ptr.vmem [resolvable:$true] %s255_s15  ;;  %s254_s16 = int_to_ptr.hbm [resolvable:$true] %s253_s16 }
  0x3b   : > { %s244_s30 = scalar_lea.sflag [#allocation6], %s243_s12  ;;  %s1070_s7 = sshra.s32 %s254_s16, 4  ;;  %s1071_s7 = int_to_ptr.hbm [resolvable:$true] %s1070_s7 }
  0x3c   : > { %s1072_s0 = scalar_lea.hbm %s1071_s7, 8  ;;  %s1077_s9 = scalar_lea.hbm %s1486_s1, 16 }
  0x3d   : > { %p1073_p11 = scmp.ne.s32.totalorder %s1071_s7, %s1072_s0  ;;  %p1078_p13 = scmp.lt.s32.totalorder %s1071_s7, %s1486_s1 }
  0x3e   : > { %p1079_p0 = scmp.lt.s32.totalorder %s1077_s9, %s1072_s0 }
  0x3f   : > { %p1075_p9 = pnand %p1073_p11, %p1044_p10 }
  0x40   : > { %p1080_p5 = por %p1079_p0, %p1078_p13 }
  0x41   : > { %p1076_p12 = pneg %p1075_p9 }
  0x43   : > { %p1081_p7 = pnand %p1080_p5, %p1076_p12 }
  0x45   : > { %1084 = shalt.err (!%p1081_p7)
}
  0x46   : > { %914 = dma.hbm_to_vmem [thread:$0]  (!%p1332_p2), %s254_s16, 128, %s256_s15, %s244_s30  }
  0x47   : > { %264 = sbr.rel (%p1293_p8) target bundleno = 781 (0x30d), region = 36  ;;  %s1370_s3 = sand.u32 (!%p1293_p8), 1, %s1202_s19  }
  0x48   : > { %s858_s20 = sshll.u32 (!%p1293_p8), %s1370_s3, 4  ;;  %s267_s12 = scalar_lea.sflag (!%p1293_p8), [#allocation3], %s1370_s3 }
  0x49   : > { %s1376_s0 = scalar_lea.vmem (!%p1293_p8), [#allocation2], %s858_s20 }
  0x4c   : > { %1173 = dma.done.wait (%p1280_p4), %s267_s12, 256  }
  0x4d   : > { %1175 = vsyncadd (%p1280_p4), %s267_s12, 4294967040  ;;  %s276_s29 = sand.u32 1, %s1271_s22   ;;  %s859_s11 = sshll.u32 %s1370_s3, 3 }
  0x4e   : > { %s277_s13 = scalar_lea.sflag [#allocation6], %s276_s29  ;;  %s280_s8 = scalar_lea.vmem [#allocation5], %s859_s11 }
  0x4f   : > { %1177 = dma.done.wait (%p1280_p4), %s277_s13, 128  }
  0x50   : > { %1179 = vsyncadd (%p1280_p4), %s277_s13, 4294967168 }
  0x51   : > { %1181 = dma.done.wait (%p50_p1), [#allocation6], 1536  }
  0x52   : > { %1183 = vsyncadd (%p50_p1), [#allocation6], 4294965760 }
  0x53   : > { %1185 = dma.done.wait (%p50_p1), [#allocation9], 1152  }
  0x54   : > { %1187 = vsyncadd (%p50_p1), [#allocation9], 4294966144  ;;  %v341_v0 = vld [vmem:[#allocation7 + $0x50] sm:$0xff]  ;;  %v338_v2 = vld [vmem:[#allocation7 + $0x38] sm:$0xff]  ;;  %vm428_vm0 = vcmask 195584   ;;  %vm343_vm1 = vcmask 261120  }
  0x55   : > { %v425_v1 = vld [vmem:[#allocation8 + $0x30] sm:$0xff]  ;;  %385 = vmatpush.msra.mxu1 %v341_v0  ;;  %v422_v3 = vld [vmem:[#allocation8 + $0x18] sm:$0xff]  ;;  %v335_v4 = vld [vmem:[#allocation7 + $0x20] sm:$0xff]  ;;  %vm515_vm2 = vcmask 64512   ;;  %vm615_vm3 = vcmask 130048   ;;  %s1420_s24 = scalar_lea.vmem [#allocation10], %s858_s20 }
  0x56   : > { %445 = vmatpush.msra.mxu3 %v425_v1  ;;  %v419_v5 = vld [vmem:[#allocation8] sm:$0xff]  ;;  %v330_v6 = vld [vmem:[%s280_s8] sm:$0xff]  ;;  %v332_v7 = vld [vmem:[#allocation7 + $0x8] sm:$0xff]  ;;  %s880_s27 = sshll.u32 %s1271_s22, 3  ;;  %s884_s28 = sshll.u32 %s1271_s22, 4 }
  0x57   : > { %386 = vmatpush.msra.mxu1 %v338_v2  ;;  %v426_v8 = vld [vmem:[#allocation8 + $0x38] sm:$0xff]  ;;  %v340_v9 = vld [vmem:[#allocation7 + $0x48] sm:$0xff]  ;;  %v328_v10 = vld [vmem:[%s1376_s0] sm:$0xff]  ;;  %s697_s16 = scalar_lea.hbm %s1490_s5, %s880_s27  ;;  %s681_s2 = scalar_lea.hbm %s1489_s4, %s884_s28 }
  0x58   : > { %446 = vmatpush.msra.mxu3 %v422_v3  ;;  %v337_v11 = vld [vmem:[#allocation7 + $0x30] sm:$0xff]  ;;  %v423_v12 = vld [vmem:[#allocation8 + $0x20] sm:$0xff]  ;;  %362 = vmatpush.msra.mxu0 %v340_v9  ;;  %v342_v13 = vld [vmem:[#allocation7 + $0x58] sm:$0xff]  ;;  %s682_s26 = sshll.u32 %s1420_s24, 4  ;;  %s327_s9 = scalar_lea.vmem [#allocation11], %s859_s11  ;;  %s1435_s26 = int_to_ptr.vmem [resolvable:$true] %s682_s26 }
  0x59   : > { %387 = vmatpush.msra.mxu1 %v335_v4  ;;  %v334_v14 = vld [vmem:[#allocation7 + $0x18] sm:$0xff]  ;;  %v420_v15 = vld [vmem:[#allocation8 + $0x8] sm:$0xff]  ;;  %v339_v16 = vld [vmem:[#allocation7 + $0x40] sm:$0xff]  ;;  %408 = vmatpush.msra.mxu2 %v342_v13  ;;  %s699_s10 = sshll.u32 %s327_s9, 4  ;;  %s701_s23 = sshll.u32 %s697_s16, 4  ;;  %s700_s10 = int_to_ptr.vmem [resolvable:$true] %s699_s10  ;;  %s702_s23 = int_to_ptr.hbm [resolvable:$true] %s701_s23 }
  0x5a   : > { %447 = vmatpush.msra.mxu3 %v419_v5  ;;  %363 = vmatpush.msra.mxu0 %v337_v11  ;;  %v331_v17 = vld [vmem:[#allocation7] sm:$0xff]  ;;  %v336_v18 = vld [vmem:[#allocation7 + $0x28] sm:$0xff]  ;;  %v333_v19 = vld [vmem:[#allocation7 + $0x10] sm:$0xff]  ;;  %s684_s20 = sshll.u32 %s681_s2, 4  ;;  %s670_s22 = scalar_lea.sflag [#allocation12], %s1370_s3  ;;  %s1437_s20 = int_to_ptr.hbm [resolvable:$true] %s684_s20 }
  0x5b   : > { %870 = vmatmul.msk.f32.vlgmr.msra.gmra.mxu3 %vm428_vm0, %v330_v6  ;;  %388 = vmatpush.msra.mxu1 %v332_v7  ;;  %v329_v20 = vld [vmem:[%s1376_s0 + $0x8] sm:$0xff]  ;;  %v427_v21 = vld [vmem:[#allocation8 + $0x40] sm:$0xff]  ;;  %v421_v31 = vld [vmem:[#allocation8 + $0x10] sm:$0xff]  ;;  %s1114_s12 = sshra.s32 %s702_s23, 4  ;;  %s1120_s13 = scalar_lea.hbm %s1490_s5, 16  ;;  %s1115_s12 = int_to_ptr.hbm [resolvable:$true] %s1114_s12 }
  0x5c   : > { %465 = vmatpush.msrb.mxu3 %v426_v8  ;;  %866 = vmatmul.msk.f32.vlgmr.msra.gmra.mxu1 %vm343_vm1, %v328_v10  ;;  %v424_v29 = vld [vmem:[#allocation8 + $0x28] sm:$0xff]  ;;  %s1116_s0 = scalar_lea.hbm %s1115_s12, 8  ;;  %p1121_p2 = scmp.lt.s32.totalorder %s1115_s12, %s1490_s5 }
  0x5d   : > { %364 = vmatpush.msra.mxu0 %v334_v14  ;;  %409 = vmatpush.msra.mxu2 %v339_v16  ;;  %p1117_p1 = scmp.ne.s32.totalorder %s1115_s12, %s1116_s0  ;;  %p1122_p10 = scmp.lt.s32.totalorder %s1120_s13, %s1116_s0 }
  0x5e   : > { %466 = vmatpush.msrb.mxu3 %v423_v12 }
  0x5f   : > { %365 = vmatpush.msra.mxu0 %v331_v17  ;;  %410 = vmatpush.msra.mxu2 %v336_v18  ;;  %p1118_p4 = pnand %p1117_p1, %p1316_p3  ;;  %p1123_p11 = por %p1122_p10, %p1121_p2 }
  0x60   : > { %467 = vmatpush.msrb.mxu3 %v420_v15  ;;  %864 = vmatmul.msk.f32.vlgmr.msra.gmra.mxu0 %vm343_vm1, %v328_v10 }
  0x61   : > { %411 = vmatpush.msra.mxu2 %v333_v19  ;;  %p1119_p8 = pneg %p1118_p4 }
  0x62   : > { %868 = vmatmul.msk.f32.vlgmr.msra.gmra.mxu2 %vm343_vm1, %v328_v10  ;;  %485 = vmatpush.msra.mxu3 %v427_v21 }
  0x63   : > { %871 = vmatmul.msk.f32.vlgmr.msrb.gmra.mxu3 %vm428_vm0, %v330_v6  ;;  %p1124_p9 = pnand %p1123_p11, %p1119_p8 }
  0x64   : > { %867 = vmatmul.msk.f32.gmra.mxu1 %vm343_vm1, %v329_v20  ;;  %486 = vmatpush.msra.mxu3 %v424_v29 }
  0x66   : > { %487 = vmatpush.msra.mxu3 %v421_v31 }
  0x68   : > { %865 = vmatmul.msk.f32.gmra.mxu0 %vm343_vm1, %v329_v20 }
  0x6a   : > { %869 = vmatmul.msk.f32.gmra.mxu2 %vm343_vm1, %v329_v20 }
  0x6b   : > { %872 = vmatmul.msk.f32.vlgmr.msra.gmra.mxu3 %vm428_vm0, %v330_v6 }
  0xd9   : > { %v390_v22 = vpop.f32.mrf.mxu1 }
  0xdd   : > { %v367_v25 = vpop.f32.mrf.mxu0 }
  0xde   : > { %v449_v23 = vpop.f32.mrf.mxu3 }
  0xe1   : > { %v393_v24 = vpop.f32.mrf.mxu1 }
  0xe2   : > { %609 = vmatpush.xpose.msrb.mxu2 %v393_v24 }
  0xe5   : > { %v370_v27 = vpop.f32.mrf.mxu0  ;;  %v413_v28 = vpop.f32.mrf.mxu2 }
  0xe6   : > { %v469_v26 = vpop.f32.mrf.mxu3  ;;  %610 = vmatpush.xpose.msrb.mxu2 %v390_v22 }
  0xe7   : > { %507 = vmatpush.xpose.msrb.mxu0 %v469_v26 }
  0xe9   : > { %611 = vmatmul.f32.vlgmr.msrb.gmra.mxu2 %v449_v23 }
  0xea   : > { %508 = vmatmul.f32.vlgmr.msrb.gmra.mxu0 %v367_v25 }
  0xed   : > { %v416_v30 = vpop.f32.mrf.mxu2 }
  0xee   : > { %657 = vmatpush.msrb.mxu3 %v416_v30  ;;  %v489_v53 = vpop.f32.mrf.mxu3 }
  0xef   : > { %585 = vmatpush.msrb.mxu1 %v489_v53 }
  0xf0   : > { %658 = vmatpush.msrb.mxu3 %v413_v28 }
  0xf2   : > { %511 = vmatmul.f32.gmra.mxu0 %v370_v27 }
 0x167   : > { %v509_v32 = vpop.f32.mrf.mxu0 }
 0x168   : > { %v516_v33 = vsel %vm515_vm2, %v509_v32, -inf }
 0x169   : > { %517 = vmax.xlane.f32.xlu0 %v516_v33 }
 0x16c   : > { %v612_v34 = vpop.f32.mrf.mxu2 }
 0x16d   : > { %v616_v36 = vsel %vm615_vm3, %v612_v34, -inf }
 0x16f   : > { %v512_v35 = vpop.f32.mrf.mxu0 }
 0x170   : > { %v519_v37 = vsel %vm515_vm2, %v512_v35, -inf }
 0x171   : > { %617 = vmax.xlane.f32.xlu0 %v616_v36  ;;  %520 = vmax.xlane.f32.xlu1 %v519_v37 }
 0x1dc   : > { %v518_v38 = vpop.xlane.xlu0 %517 }
 0x1dd   : > { %v522_v39 = vsub.f32 %v509_v32, %v518_v38 }
 0x1df   : > { %v524_v40 = vmul.f32 1.442695, %v522_v39 }
 0x1e1   : > { %968 = vpow2.f32 %v524_v40 }
 0x1e4   : > { %v618_v41 = vpop.xlane.xlu0 %617  ;;  %v521_v42 = vpop.xlane.xlu1 %520 }
 0x1e5   : > { %v619_v43 = vsub.f32 %v612_v34, %v618_v41  ;;  %v523_v46 = vsub.f32 %v512_v35, %v521_v42 }
 0x1e7   : > { %v969_v44 = vpop.eup %968  ;;  %v620_v45 = vmul.f32 1.442695, %v619_v43  ;;  %v526_v48 = vmul.f32 1.442695, %v523_v46 }
 0x1e8   : > { %v528_v47 = vsel %vm515_vm2, %v969_v44, 0.0 }
 0x1e9   : > { %970 = vpow2.f32 %v620_v45  ;;  %529 = vadd.xlane.f32.xlu1 %v528_v47 }
 0x1ea   : > { %972 = vpow2.f32 %v526_v48 }
 0x1ef   : > { %v971_v49 = vpop.eup %970 }
 0x1f0   : > { %v622_v50 = vsel %vm615_vm3, %v971_v49, 0.0  ;;  %v973_v51 = vpop.eup %972 }
 0x1f1   : > { %623 = vadd.xlane.f32.xlu2 %v622_v50  ;;  %v531_v52 = vsel %vm515_vm2, %v973_v51, 0.0 }
 0x1f9   : > { %532 = vadd.xlane.f32.xlu2 %v531_v52 }
 0x25c   : > { %v530_v54 = vpop.xlane.xlu1 %529 }
 0x25d   : > { %974 = vrcp.f32 %v530_v54  ;;  %v545_v60 = vand.u32 2147483648, %v530_v54  ;;  %v543_v61 = vand.u32 2147483647, %v530_v54  ;;  %vm539_vm5 = vweird.f32 %v530_v54 }
 0x25f   : > { %v546_v1 = vor.u32 1.1754944e-38, %v545_v60  ;;  %vm544_vm7 = vcmp.eq.f32.partialorder %v543_v61, 8.507059e+37 }
 0x263   : > { %v975_v55 = vpop.eup %974 }
 0x264   : > { %v535_v56 = vmul.f32 %v975_v55, %v530_v54  ;;  %v624_v57 = vpop.xlane.xlu2 %623  ;;  %vm540_vm4 = vweird.f32 %v975_v55 }
 0x265   : > { %976 = vrcp.f32 %v624_v57  ;;  %vm541_vm6 = vmor %vm539_vm5, %vm540_vm4  ;;  %v636_v6 = vand.u32 2147483648, %v624_v57  ;;  %v634_v9 = vand.u32 2147483647, %v624_v57  ;;  %vm630_vm9 = vweird.f32 %v624_v57 }
 0x266   : > { %v536_v58 = vsub.f32 1.0, %v535_v56 }
 0x267   : > { %v637_v12 = vor.u32 1.1754944e-38, %v636_v6  ;;  %vm635_vm11 = vcmp.eq.f32.partialorder %v634_v9, 8.507059e+37 }
 0x268   : > { %v537_v59 = vmul.f32 %v975_v55, %v536_v58 }
 0x26a   : > { %v538_v62 = vadd.f32 %v975_v55, %v537_v59 }
 0x26b   : > { %v977_v63 = vpop.eup %976 }
 0x26c   : > { %v542_v0 = vsel %vm541_vm6, %v975_v55, %v538_v62  ;;  %v626_v2 = vmul.f32 %v977_v63, %v624_v57  ;;  %v533_v3 = vpop.xlane.xlu2 %532  ;;  %vm631_vm8 = vweird.f32 %v977_v63 }
 0x26d   : > { %978 = vrcp.f32 %v533_v3  ;;  %v547_v5 = vsel %vm544_vm7, %v546_v1, %v542_v0  ;;  %vm632_vm10 = vmor %vm630_vm9, %vm631_vm8  ;;  %v559_v18 = vand.u32 2147483648, %v533_v3  ;;  %v557_v20 = vand.u32 2147483647, %v533_v3 }
 0x26e   : > { %v627_v4 = vsub.f32 1.0, %v626_v2  ;;  %v562_v7 = vmul.f32 %v969_v44, %v547_v5  ;;  %vm553_vm13 = vweird.f32 %v533_v3 }
 0x26f   : > { %v560_v22 = vor.u32 1.1754944e-38, %v559_v18  ;;  %vm558_vm15 = vcmp.eq.f32.partialorder %v557_v20, 8.507059e+37 }
 0x270   : > { %v628_v8 = vmul.f32 %v977_v63, %v627_v4  ;;  %873 = vmatmul.msk.f32.vlgmr.msrb.gmra.mxu1 %vm515_vm2, %v562_v7 }
 0x272   : > { %v629_v10 = vadd.f32 %v977_v63, %v628_v8 }
 0x273   : > { %v979_v11 = vpop.eup %978 }
 0x274   : > { %v633_v13 = vsel %vm632_vm10, %v977_v63, %v629_v10  ;;  %v549_v14 = vmul.f32 %v979_v11, %v533_v3  ;;  %vm554_vm12 = vweird.f32 %v979_v11 }
 0x275   : > { %v638_v15 = vsel %vm635_vm11, %v637_v12, %v633_v13  ;;  %vm555_vm14 = vmor %vm553_vm13, %vm554_vm12 }
 0x276   : > { %v550_v16 = vsub.f32 1.0, %v549_v14  ;;  %v639_v17 = vmul.f32 %v971_v49, %v638_v15 }
 0x278   : > { %v551_v19 = vmul.f32 %v979_v11, %v550_v16  ;;  %875 = vmatmul.msk.f32.vlgmr.msrb.gmra.mxu3 %vm615_vm3, %v639_v17 }
 0x27a   : > { %v552_v21 = vadd.f32 %v979_v11, %v551_v19 }
 0x27c   : > { %v556_v23 = vsel %vm555_vm14, %v979_v11, %v552_v21 }
 0x27d   : > { %v561_v24 = vsel %vm558_vm15, %v560_v22, %v556_v23 }
 0x27e   : > { %v563_v25 = vmul.f32 %v973_v51, %v561_v24 }
 0x280   : > { %874 = vmatmul.msk.f32.gmra.mxu1 %vm515_vm2, %v563_v25 }
 0x2ed   : > { %v587_v26 = vpop.f32.mrf.mxu1 }
 0x2ee   : > { %593 = vst.msk [vmem:[%s1420_s24] sm:$0xff] %vm343_vm1, %v587_v26 }
 0x2fb   : > { %v660_v27 = vpop.f32.mrf.mxu3 }
 0x2fc   : > { %663 = vst.msk [vmem:[%s327_s9] sm:$0xff] %vm343_vm1, %v660_v27 }
 0x2fd   : > { %v590_v28 = vpop.f32.mrf.mxu1 }
 0x2fe   : > { %1127 = shalt.err (!%p1124_p9)
}
 0x2ff   : > { %898 = dma.vmem_to_hbm [thread:$0]  (%p1316_p3), %s700_s10, 128, %s702_s23, %s670_s22   ;;  %594 = vst.msk [vmem:[%s1420_s24 + $0x8] sm:$0xff] %vm343_vm1, %v590_v28 }
 0x300   : > { %s665_s28 = scalar_lea.sflag [#allocation4], %s1370_s3  ;;  %s1142_s6 = sshra.s32 %s1437_s20, 4  ;;  %s1143_s6 = int_to_ptr.hbm [resolvable:$true] %s1142_s6 }
 0x301   : > { %s1144_s15 = scalar_lea.hbm %s1143_s6, 16  ;;  %s1148_s7 = scalar_lea.hbm %s1489_s4, 32 }
 0x302   : > { %p1145_p12 = scmp.ne.s32.totalorder %s1143_s6, %s1144_s15  ;;  %p1149_p5 = scmp.lt.s32.totalorder %s1143_s6, %s1489_s4 }
 0x303   : > { %p1150_p7 = scmp.lt.s32.totalorder %s1148_s7, %s1144_s15 }
 0x304   : > { %p1146_p13 = pnand %p1145_p12, %p1316_p3 }
 0x305   : > { %p1151_p1 = por %p1150_p7, %p1149_p5 }
 0x306   : > { %p1147_p0 = pneg %p1146_p13 }
 0x308   : > { %p1152_p4 = pnand %p1151_p1, %p1147_p0 }
 0x30a   : > { %1155 = shalt.err (!%p1152_p4)
}
 0x30b   : > { %s1218_s3 = smov 128   ;;  %s1219_s24 = smov 8  }
 0x30c   : > { %897 = dma.vmem_to_hbm [thread:$0]  (%p1316_p3), %s1435_s26, 256, %s1437_s20, %s665_s28, %s1218_s3, %s1218_s3, %s1219_s24  }
 0x30d PF: > { %s713_s10 = sand.u32 1, %s1198_s18   ;;  %p1505_p8 = scmp.ge.s32.totalorder %s1210_s21, 2 }
 0x30e   : > { %s714_s23 = scalar_lea.sflag [#allocation4], %s713_s10 }
 0x30f   : > { %p916_p2 = pnand %p1505_p8, %p1285_p6 }
 0x311   : > { %p917_p10 = pneg %p916_p2 }
 0x313   : > { %1189 = dma.done.wait (%p917_p10), %s714_s23, 256  }
 0x314   : > { %1191 = vsyncadd (%p917_p10), %s714_s23, 4294967040  ;;  %s724_s22 = scalar_lea.sflag [#allocation12], %s713_s10 }
 0x315   : > { %1193 = dma.done.wait (%p917_p10), %s724_s22, 128  }
 0x316   : > { %1195 = vsyncadd (%p917_p10), %s724_s22, 4294967168  ;;  %s1506_s12 = sld [smem:[#allocation19_spill]]  ;;  %p26_p3 = scmp.ge.s32.totalorder %s1306_s14, 4  }
 0x317   : > { %s1507_s20 = sld [smem:[#allocation20_spill]]  ;;  %s1508_s18 = smov %s1202_s19 }
 0x318   : > { %s1510_s21 = smov %s1306_s14  ;;  %28 = sbr.rel (!%p26_p3) target bundleno = 14 (0xe), region = 119 }
 0x31c   : > { %s1509_s19 = smov %s1506_s12 }
 0x31d   :  { %730 = vsyncpa [#allocation3], 1 }
 0x31e   :  { %732 = vsyncpa [#allocation3 + $0x1], 1 }
 0x31f   :  { %733 = vsyncpa [#allocation6], 1 }
 0x320   :  { %735 = vsyncpa [#allocation6 + $0x1], 1 }
 0x321   :  { %736 = vsyncpa [#allocation9], 1 }
 0x322   :  { %737 = vsyncpa [#allocation4], 1 }
 0x323   :  { %739 = vsyncpa [#allocation4 + $0x1], 1 }
 0x324   :  { %740 = vsyncpa [#allocation12], 1 }
 0x325   :  { %742 = vsyncpa [#allocation12 + $0x1], 1 }

</bundles_post_ra>
